<compile_context>
chip_gen: v5e
topology: v5e:2x2
jax: 0.10.0
libtpu: 0.0.40
codegen_flags: <defaults>
</compile_context>

<pallas_src>
import functools
import math

import jax
import jax.numpy as jnp
from jax.experimental import pallas as pl
from jax.experimental.pallas import tpu as pltpu

INPUT_SIZE = 1
OUTPUT_SIZE = 2

LANES = 128                        # x lanes per block row (MXU contraction dim)
OUT_LANES = LANES * OUTPUT_SIZE    # 256 interleaved output lanes per block row
TM_DEFAULT = 8192                  # sublane rows per block (~24 MiB double-buffered)


def projector_kernel(x_ref, s_ref, b_ref, o_ref):
    # Single MXU matmul performs the folded affine map AND the (y0, y1) lane
    # interleave:  o[r, 2c+j] = x[r, c] * w_eff[j] + b_eff[j].
    # S is mostly zeros, so the dot is numerically a single multiply per
    # output element; precision=HIGHEST keeps it f32-exact.
    x = x_ref[...].astype(jnp.float32)
    y = jnp.dot(x, s_ref[...],
                preferred_element_type=jnp.float32,
                precision=jax.lax.Precision.HIGHEST)
    o_ref[...] = (y + b_ref[...]).astype(o_ref.dtype)


def example_projector(image_features, w1, b1, w2, b2, *, tm_max=TM_DEFAULT):
    """Equivalent of ExampleProjector.forward.

    image_features: [..., INPUT_SIZE] float
    w1: [OUTPUT_SIZE, INPUT_SIZE] (PyTorch layout), b1: [OUTPUT_SIZE]
    w2: [OUTPUT_SIZE, OUTPUT_SIZE],                 b2: [OUTPUT_SIZE]
    returns: [..., OUTPUT_SIZE]
    """
    orig_shape = image_features.shape
    assert orig_shape[-1] == INPUT_SIZE
    lead = orig_shape[:-1]
    m = math.prod(lead) if lead else 1
    out_dtype = image_features.dtype

    if m == 0:  # empty batch: nothing to do
        return jnp.zeros((*lead, OUTPUT_SIZE), out_dtype)

    # Fold the two bias-only-separated linears into one affine map (exact):
    #   y = (x @ w1.T + b1) @ w2.T + b2 = x * w_eff + b_eff
    w_eff = (w1.T @ w2.T).reshape(OUTPUT_SIZE).astype(jnp.float32)      # [2]
    b_eff = (b1 @ w2.T + b2).reshape(OUTPUT_SIZE).astype(jnp.float32)   # [2]

    # Spread-and-scale matrix: S[k, 2c+j] = w_eff[j] if k == c else 0, plus the
    # matching interleaved bias row. x @ S writes the outputs already in
    # [M, 2] row-major order, so no epilogue transpose is needed.
    col = jnp.arange(OUT_LANES)
    k = jnp.arange(LANES)
    s_mat = jnp.where(k[:, None] == (col[None, :] // OUTPUT_SIZE),
                      w_eff[col[None, :] % OUTPUT_SIZE],
                      jnp.float32(0.0)).astype(jnp.float32)              # [128, 256]
    b_row = b_eff[col % OUTPUT_SIZE].reshape(1, OUT_LANES)               # [1, 256]

    # Lane-dense view of the flat input. Zero-copy when m is LANES-aligned;
    # only unaligned sizes pay a (small) tail-pad copy.
    x_flat = image_features.reshape(m)
    m_padded = ((m + LANES - 1) // LANES) * LANES
    if m_padded != m:
        x_flat = jnp.pad(x_flat, (0, m_padded - m))
    rows = m_padded // LANES
    x2 = x_flat.reshape(rows, LANES)

    if rows <= tm_max:
        tm = rows                       # single block == full array (any row count ok)
    else:
        tm = max(8, (tm_max // 8) * 8)  # block sublane dim must be a multiple of 8
    num_blocks = (rows + tm - 1) // tm  # ragged trailing block handled by Pallas

    out = pl.pallas_call(
        projector_kernel,
        out_shape=jax.ShapeDtypeStruct((rows, OUT_LANES), out_dtype),
        grid_spec=pltpu.PrefetchScalarGridSpec(
            num_scalar_prefetch=0,
            grid=(num_blocks,),
            in_specs=[
                pl.BlockSpec((tm, LANES), lambda i: (i, 0)),          # x tile
                pl.BlockSpec((LANES, OUT_LANES), lambda i: (0, 0)),   # S (resident)
                pl.BlockSpec((1, OUT_LANES), lambda i: (0, 0)),       # bias row
            ],
            out_specs=pl.BlockSpec((tm, OUT_LANES), lambda i: (i, 0)),
        ),
        compiler_params=pltpu.CompilerParams(
            dimension_semantics=("parallel",),
            vmem_limit_bytes=40 * 1024 * 1024,   # ~24 MiB double-buffered + headroom
        ),
    )(x2, s_mat, b_row)

    # Zero-copy epilogue: (rows, 256) flat == [m_padded, 2] row-major.
    y = out.reshape(m_padded, OUTPUT_SIZE)
    if m_padded != m:
        y = y[:m]
    return y.reshape(*lead, OUTPUT_SIZE)


def init_params(key):
    """Deterministic init mimicking nn.Linear defaults (uniform(+/- 1/sqrt(fan_in)))."""
    k1, k2, k3, k4 = jax.random.split(key, 4)
    bound1 = 1.0 / math.sqrt(INPUT_SIZE)
    bound2 = 1.0 / math.sqrt(OUTPUT_SIZE)
    w1 = jax.random.uniform(k1, (OUTPUT_SIZE, INPUT_SIZE), jnp.float32, -bound1, bound1)
    b1 = jax.random.uniform(k2, (OUTPUT_SIZE,), jnp.float32, -bound1, bound1)
    w2 = jax.random.uniform(k3, (OUTPUT_SIZE, OUTPUT_SIZE), jnp.float32, -bound2, bound2)
    b2 = jax.random.uniform(k4, (OUTPUT_SIZE,), jnp.float32, -bound2, bound2)
    return w1, b1, w2, b2


if __name__ == "__main__":
    key = jax.random.PRNGKey(0)
    k_params, k_x1, k_x2 = jax.random.split(key, 3)

    w1, b1, w2, b2 = init_params(k_params)

    def ref_fn(x):
        return (x @ w1.T + b1) @ w2.T + b2

    # Case 1: tiny VLM-style input (batch=2, seq=8, in_features=1), unaligned M,
    # run under jit.
    x1 = jax.random.normal(k_x1, (2, 8, INPUT_SIZE), dtype=jnp.float32)
    proj = jax.jit(functools.partial(example_projector, w1=w1, b1=b1, w2=w2, b2=b2))
    y1 = jax.block_until_ready(proj(x1))
    assert y1.shape == (2, 8, OUTPUT_SIZE)
    assert jnp.allclose(y1, ref_fn(x1), atol=1e-5, rtol=1e-5)

    # Case 2: LANES-aligned M (zero-copy path) with a multi-step grid and a
    # ragged trailing block (rows=20, tm=8 -> 3 grid steps).
    x2 = jax.random.normal(k_x2, (4, 640, INPUT_SIZE), dtype=jnp.float32)
    y2 = jax.block_until_ready(example_projector(x2, w1, b1, w2, b2, tm_max=8))
    assert y2.shape == (4, 640, OUTPUT_SIZE)
    assert jnp.allclose(y2, ref_fn(x2), atol=1e-5, rtol=1e-5)

    print("KERNEL_OK")
</pallas_src>

<mosaic_0001>
module attributes {stable_mosaic.version = 11 : i64} {
  func.func @projector_kernel(%arg0: i32, %arg1: memref<1x128xf32, #tpu.memory_space<vmem>>, %arg2: memref<128x256xf32, #tpu.memory_space<vmem>>, %arg3: memref<1x256xf32, #tpu.memory_space<vmem>>, %arg4: memref<1x256xf32, #tpu.memory_space<vmem>>) attributes {dimension_semantics = [#tpu.dimension_semantics<parallel>], iteration_bounds = array<i64: 1>, scalar_prefetch = 0 : i64, scratch_operands = 0 : i64, tpu.core_type = #tpu.core_type<tc>, window_params = [{transform_indices = @transform_0, window_bounds = array<i64: 1, 128>}, {pipeline_mode = #tpu.pipeline_mode<synchronous>, transform_indices = @transform_1, window_bounds = array<i64: 128, 256>}, {pipeline_mode = #tpu.pipeline_mode<synchronous>, transform_indices = @transform_2, window_bounds = array<i64: 1, 256>}, {transform_indices = @transform_3, window_bounds = array<i64: 1, 256>}]} {
    %c0 = arith.constant 0 : index
    %c0_0 = arith.constant 0 : index
    %0 = vector.load %arg1[%c0, %c0_0] : memref<1x128xf32, #tpu.memory_space<vmem>>, vector<1x128xf32>
    %c0_1 = arith.constant 0 : index
    %c0_2 = arith.constant 0 : index
    %1 = vector.load %arg2[%c0_1, %c0_2] : memref<128x256xf32, #tpu.memory_space<vmem>>, vector<128x256xf32>
    %cst = arith.constant dense<0.000000e+00> : vector<1x256xf32>
    %2 = tpu.matmul %0, %1, %cst {dimension_numbers = #tpu.dot_dimension_numbers<[1], [0], [0], [1], [0, 0, 1, 1], [], []>, precision = #tpu.contract_precision<fp32>} : vector<1x128xf32>, vector<128x256xf32>, vector<1x256xf32> -> vector<1x256xf32>
    %c0_3 = arith.constant 0 : index
    %c0_4 = arith.constant 0 : index
    %3 = vector.load %arg3[%c0_3, %c0_4] : memref<1x256xf32, #tpu.memory_space<vmem>>, vector<1x256xf32>
    %4 = arith.addf %2, %3 : vector<1x256xf32>
    %c0_5 = arith.constant 0 : index
    %c0_6 = arith.constant 0 : index
    %5 = vector.load %arg4[%c0_5, %c0_6] : memref<1x256xf32, #tpu.memory_space<vmem>>, vector<1x256xf32>
    tpu.vector_store %arg4[%c0_5, %c0_6], %4 {strides = array<i32>} : memref<1x256xf32, #tpu.memory_space<vmem>>, vector<1x256xf32>,
    return
  }
  func.func @transform_0(%arg0: i32) -> (i32, i32) {
    %c0_i32 = arith.constant 0 : i32
    %c0_i32_0 = arith.constant 0 : i32
    return %arg0, %c0_i32 : i32, i32
  }
  func.func @transform_1(%arg0: i32) -> (i32, i32) {
    %c0_i32 = arith.constant 0 : i32
    %c0_i32_0 = arith.constant 0 : i32
    %c0_i32_1 = arith.constant 0 : i32
    return %c0_i32, %c0_i32_0 : i32, i32
  }
  func.func @transform_2(%arg0: i32) -> (i32, i32) {
    %c0_i32 = arith.constant 0 : i32
    %c0_i32_0 = arith.constant 0 : i32
    %c0_i32_1 = arith.constant 0 : i32
    return %c0_i32, %c0_i32_0 : i32, i32
  }
  func.func @transform_3(%arg0: i32) -> (i32, i32) {
    %c0_i32 = arith.constant 0 : i32
    %c0_i32_0 = arith.constant 0 : i32
    return %arg0, %c0_i32 : i32, i32
  }
}

</mosaic_0001>

<bundles_post_ra>
// kernel: example_projector.1
= control target key start
LH: loop header
LB: loop body
LE: loop exit
PB: predicated region body
PF: predicated region fallthrough
CT: control target
= control target key end

     0   :  { %vm738_vm0 = vcmask 1040384   ;;  %s1375_s1 = inlined_call_operand.vmem [shape: f32[128,256], index: 1, kind: input, shape index: {}]   ;;  %s1376_s0 = inlined_call_operand.vmem [shape: f32[1,128], index: 0, kind: input, shape index: {}]   ;;  %s1377_s2 = inlined_call_operand.vmem [shape: f32[1,256], index: 2, kind: input, shape index: {}]   ;;  %s1378_s3 = inlined_call_operand.vmem [shape: f32[1,256], index: 3, kind: output, shape index: {}]  }
   0x1   :  { %v45_v0 = vld [vmem:[%s1375_s1 + $0xf0] sm:$0xff]  ;;  %v43_v1 = vld [vmem:[%s1375_s1 + $0xe0] sm:$0xff]  ;;  %v46_v60 = vld [vmem:[%s1375_s1 + $0xf8] sm:$0xff] }
   0x2   :  { %v41_v2 = vld [vmem:[%s1375_s1 + $0xd0] sm:$0xff]  ;;  %v779_v3 = vand.u32 4294901760, %v45_v0  ;;  %v781_v4 = vand.u32 4294901760, %v43_v1  ;;  %v39_v6 = vld [vmem:[%s1375_s1 + $0xc0] sm:$0xff]  ;;  %v44_v63 = vld [vmem:[%s1375_s1 + $0xe8] sm:$0xff] }
   0x3   :  { %v783_v5 = vand.u32 4294901760, %v41_v2  ;;  %v37_v7 = vld [vmem:[%s1375_s1 + $0xb0] sm:$0xff]  ;;  %v35_v8 = vld [vmem:[%s1375_s1 + $0xa0] sm:$0xff]  ;;  %v794_v9 = vand.u32 4294901760, %v39_v6 }
   0x4   :  { %v796_v10 = vand.u32 4294901760, %v37_v7  ;;  %v798_v11 = vand.u32 4294901760, %v35_v8  ;;  %v33_v12 = vld [vmem:[%s1375_s1 + $0x90] sm:$0xff]  ;;  %v31_v13 = vld [vmem:[%s1375_s1 + $0x80] sm:$0xff]  ;;  %v807_v14 = vsub.f32 %v45_v0, %v779_v3  ;;  %54 = vmatpush.msra.mxu0 %v779_v3  ;;  %v811_v15 = vsub.f32 %v43_v1, %v781_v4  ;;  %250 = vmatpush.msra.mxu3 %v779_v3 }
   0x5   :  { %v815_v16 = vsub.f32 %v41_v2, %v783_v5  ;;  %v817_v17 = vand.u32 4294901760, %v33_v12  ;;  %v820_v18 = vsub.f32 %v39_v6, %v794_v9  ;;  %v833_v24 = vand.u32 4294901760, %v31_v13  ;;  %v29_v25 = vld [vmem:[%s1375_s1 + $0x70] sm:$0xff]  ;;  %v27_v34 = vld [vmem:[%s1375_s1 + $0x60] sm:$0xff] }
   0x6   :  { %v823_v19 = vsub.f32 %v37_v7, %v796_v10  ;;  %v826_v20 = vsub.f32 %v35_v8, %v798_v11  ;;  %197 = vmatpush.msra.mxu2 %v807_v14  ;;  %56 = vmatpush.msra.mxu0 %v781_v4  ;;  %v1393_v21 = vand.u32 4294901760, %v807_v14  ;;  %v1392_v22 = vand.u32 4294901760, %v811_v15  ;;  %v25_v35 = vld [vmem:[%s1375_s1 + $0x50] sm:$0xff]  ;;  %v23_v40 = vld [vmem:[%s1375_s1 + $0x40] sm:$0xff] }
   0x7   :  { %v1391_v23 = vand.u32 4294901760, %v815_v16  ;;  %252 = vmatpush.msra.mxu3 %v781_v4  ;;  %v1390_v26 = vand.u32 4294901760, %v820_v18  ;;  %v841_v27 = vsub.f32 %v33_v12, %v817_v17  ;;  %v857_v33 = vand.u32 4294901760, %v29_v25  ;;  %v21_v48 = vld [vmem:[%s1375_s1 + $0x30] sm:$0xff]  ;;  %v19_v53 = vld [vmem:[%s1375_s1 + $0x20] sm:$0xff] }
   0x8   :  { %200 = vmatpush.msra.mxu2 %v811_v15  ;;  %v97_v28 = vsub.f32 %v807_v14, %v1393_v21  ;;  %58 = vmatpush.msra.mxu0 %v783_v5  ;;  %v103_v29 = vsub.f32 %v811_v15, %v1392_v22  ;;  %v1387_v31 = vand.u32 4294901760, %v823_v19  ;;  %v1386_v32 = vand.u32 4294901760, %v826_v20  ;;  %v17_v59 = vld [vmem:[%s1375_s1 + $0x10] sm:$0xff]  ;;  %v15_v6 = vld [vmem:[%s1375_s1] sm:$0xff] }
   0x9   :  { %v109_v30 = vsub.f32 %v815_v16, %v1391_v23  ;;  %254 = vmatpush.msra.mxu3 %v783_v5  ;;  %v115_v38 = vsub.f32 %v820_v18, %v1390_v26  ;;  %v871_v39 = vsub.f32 %v31_v13, %v833_v24  ;;  %v1384_v41 = vand.u32 4294901760, %v841_v27  ;;  %v42_v13 = vld [vmem:[%s1375_s1 + $0xd8] sm:$0xff] }
   0xa   :  { %v98_v36 = vand.u32 4294901760, %v97_v28  ;;  %203 = vmatpush.msra.mxu2 %v815_v16  ;;  %v104_v37 = vand.u32 4294901760, %v103_v29  ;;  %60 = vmatpush.msra.mxu0 %v794_v9  ;;  %v879_v42 = vsub.f32 %v29_v25, %v857_v33  ;;  %v121_v44 = vsub.f32 %v823_v19, %v1387_v31 }
   0xb   :  { %256 = vmatpush.msra.mxu3 %v794_v9  ;;  %v110_v43 = vand.u32 4294901760, %v109_v30  ;;  %v885_v45 = vand.u32 4294901760, %v27_v34  ;;  %v887_v46 = vand.u32 4294901760, %v25_v35  ;;  %v891_v47 = vand.u32 4294901760, %v23_v40 }
   0xc   :  { %99 = vmatpush.msra.mxu1 %v98_v36  ;;  %206 = vmatpush.msra.mxu2 %v820_v18  ;;  %v116_v49 = vand.u32 4294901760, %v115_v38  ;;  %v127_v50 = vsub.f32 %v826_v20, %v1386_v32  ;;  %v1383_v51 = vand.u32 4294901760, %v871_v39  ;;  %v1382_v54 = vand.u32 4294901760, %v879_v42 }
   0xd   :  { %62 = vmatpush.msra.mxu0 %v796_v10  ;;  %258 = vmatpush.msra.mxu3 %v796_v10  ;;  %v902_v52 = vsub.f32 %v27_v34, %v885_v45  ;;  %v122_v55 = vand.u32 4294901760, %v121_v44  ;;  %v133_v56 = vsub.f32 %v841_v27, %v1384_v41  ;;  %v915_v57 = vsub.f32 %v25_v35, %v887_v46 }
   0xe   :  { %105 = vmatpush.msra.mxu1 %v104_v37  ;;  %209 = vmatpush.msra.mxu2 %v823_v19  ;;  %v917_v58 = vand.u32 4294901760, %v21_v48  ;;  %v928_v61 = vsub.f32 %v23_v40, %v891_v47  ;;  %v930_v62 = vand.u32 4294901760, %v19_v53  ;;  %v128_v0 = vand.u32 4294901760, %v127_v50  ;;  %v40_v37 = vld [vmem:[%s1375_s1 + $0xc8] sm:$0xff]  ;;  %v38_v50 = vld [vmem:[%s1375_s1 + $0xb8] sm:$0xff] }
   0xf   :  { %64 = vmatpush.msra.mxu0 %v798_v11  ;;  %260 = vmatpush.msra.mxu3 %v798_v11  ;;  %v139_v1 = vsub.f32 %v871_v39, %v1383_v51  ;;  %v1380_v2 = vand.u32 4294901760, %v902_v52  ;;  %v145_v7 = vsub.f32 %v879_v42, %v1382_v54  ;;  %v948_v8 = vand.u32 4294901760, %v17_v59 }
  0x10   :  { %111 = vmatpush.msra.mxu1 %v110_v43  ;;  %212 = vmatpush.msra.mxu2 %v826_v20  ;;  %v950_v12 = vand.u32 4294901760, %v46_v60  ;;  %v134_v25 = vand.u32 4294901760, %v133_v56  ;;  %v1379_v28 = vand.u32 4294901760, %v915_v57  ;;  %v958_v29 = vsub.f32 %v21_v48, %v917_v58 }
  0x11   :  { %66 = vmatpush.msra.mxu0 %v817_v17  ;;  %262 = vmatpush.msra.mxu3 %v817_v17  ;;  %v960_v30 = vand.u32 4294901760, %v44_v63  ;;  %v1381_v34 = vand.u32 4294901760, %v928_v61  ;;  %v966_v35 = vsub.f32 %v19_v53, %v930_v62  ;;  %v968_v36 = vand.u32 4294901760, %v15_v6 }
  0x12   :  { %117 = vmatpush.msra.mxu1 %v116_v49  ;;  %215 = vmatpush.msra.mxu2 %v841_v27  ;;  %1409 = vst [vmem:[#allocation2_spill] sm:$0xff] %v950_v12  ;;  %v140_v38 = vand.u32 4294901760, %v139_v1  ;;  %v151_v40 = vsub.f32 %v902_v52, %v1380_v2  ;;  %v978_v43 = vsub.f32 %v46_v60, %v950_v12  ;;  %v980_v44 = vand.u32 4294901760, %v42_v13 }
  0x13   :  { %68 = vmatpush.msra.mxu0 %v833_v24  ;;  %264 = vmatpush.msra.mxu3 %v833_v24  ;;  %1410 = vst [vmem:[#allocation3_spill] sm:$0xff] %v968_v36  ;;  %v146_v48 = vand.u32 4294901760, %v145_v7  ;;  %v985_v49 = vsub.f32 %v17_v59, %v948_v8  ;;  %v157_v53 = vsub.f32 %v915_v57, %v1379_v28  ;;  %v998_v60 = vand.u32 4294901760, %v40_v37  ;;  %v36_v59 = vld [vmem:[%s1375_s1 + $0xa8] sm:$0xff] }
  0x14   :  { %123 = vmatpush.msra.mxu1 %v122_v55  ;;  %218 = vmatpush.msra.mxu2 %v871_v39  ;;  %v1385_v55 = vand.u32 4294901760, %v958_v29  ;;  %v996_v56 = vsub.f32 %v44_v63, %v960_v30  ;;  %v1388_v1 = vand.u32 4294901760, %v966_v35  ;;  %v1010_v7 = vsub.f32 %v15_v6, %v968_v36  ;;  %v34_v6 = vld [vmem:[%s1375_s1 + $0x98] sm:$0xff] }
  0x15   :  { %70 = vmatpush.msra.mxu0 %v857_v33  ;;  %266 = vmatpush.msra.mxu3 %v857_v33  ;;  %v152_v63 = vand.u32 4294901760, %v151_v40  ;;  %v1015_v28 = vsub.f32 %v42_v13, %v980_v44  ;;  %v1017_v2 = vand.u32 4294901760, %v38_v50  ;;  %v1022_v54 = vand.u32 4294901760, %v36_v59 }
  0x16   :  { %129 = vmatpush.msra.mxu1 %v128_v0  ;;  %221 = vmatpush.msra.mxu2 %v879_v42  ;;  %1411 = vst [vmem:[#allocation4_spill] sm:$0xff] %v996_v56  ;;  %v163_v0 = vsub.f32 %v928_v61, %v1381_v34  ;;  %v1395_v34 = vand.u32 4294901760, %v985_v49  ;;  %v169_v13 = vsub.f32 %v958_v29, %v1385_v55  ;;  %v1394_v40 = vand.u32 4294901760, %v996_v56  ;;  %v32_v55 = vld [vmem:[%s1375_s1 + $0x88] sm:$0xff] }
  0x17   :  { %72 = vmatpush.msra.mxu0 %v885_v45  ;;  %268 = vmatpush.msra.mxu3 %v885_v45  ;;  %1412 = vst [vmem:[#allocation5_spill] sm:$0xff] %v1015_v28  ;;  %v1033_v51 = vsub.f32 %v40_v37, %v998_v60  ;;  %v1050_v32 = vsub.f32 %v38_v50, %v1017_v2  ;;  %v1052_v31 = vand.u32 4294901760, %v34_v6  ;;  %v1070_v22 = vand.u32 4294901760, %v32_v55 }
  0x18   :  { %135 = vmatpush.msra.mxu1 %v134_v25  ;;  %224 = vmatpush.msra.mxu2 %v902_v52  ;;  %v1389_v25 = vand.u32 4294901760, %v978_v43  ;;  %v164_v41 = vand.u32 4294901760, %v163_v0  ;;  %v1399_v0 = vand.u32 4294901760, %v1015_v28  ;;  %v170_v50 = vand.u32 4294901760, %v169_v13  ;;  %v28_v13 = vld [vmem:[%s1375_s1 + $0x68] sm:$0xff] }
  0x19   :  { %74 = vmatpush.msra.mxu0 %v887_v46  ;;  %270 = vmatpush.msra.mxu3 %v887_v46  ;;  %1413 = vst [vmem:[#allocation6_spill] sm:$0xff] %v1033_v51  ;;  %v444_v26 = vsub.f32 %v996_v56, %v1394_v40  ;;  %v1088_v23 = vsub.f32 %v34_v6, %v1052_v31  ;;  %v1415_v56 = vand.u32 4294901760, %v807_v14  ;;  %v22_v14 = vld [vmem:[%s1375_s1 + $0x38] sm:$0xff] }
  0x1a   :  { %141 = vmatpush.msra.mxu1 %v140_v38  ;;  %227 = vmatpush.msra.mxu2 %v915_v57  ;;  %v158_v38 = vand.u32 4294901760, %v157_v53  ;;  %v1396_v53 = vand.u32 4294901760, %v1010_v7  ;;  %v438_v37 = vsub.f32 %v978_v43, %v1389_v25  ;;  %v1063_v25 = vsub.f32 %v36_v59, %v1022_v54 }
  0x1b   :  { %76 = vmatpush.msra.mxu0 %v891_v47  ;;  %272 = vmatpush.msra.mxu3 %v891_v47 }
  0x1c   :  { %147 = vmatpush.msra.mxu1 %v146_v48  ;;  %230 = vmatpush.msra.mxu2 %v928_v61  ;;  %v175_v48 = vsub.f32 %v966_v35, %v1388_v1  ;;  %v30_v1 = vld [vmem:[%s1375_s1 + $0x78] sm:$0xff]  ;;  %v187_v59 = vsub.f32 %v1010_v7, %v1396_v53  ;;  %v439_v40 = vand.u32 4294901760, %v438_v37  ;;  %v445_v37 = vand.u32 4294901760, %v444_v26  ;;  %v24_v26 = vld [vmem:[%s1375_s1 + $0x48] sm:$0xff] }
  0x1d   :  { %78 = vmatpush.msra.mxu0 %v917_v58  ;;  %274 = vmatpush.msra.mxu3 %v917_v58 }
  0x1e   :  { %153 = vmatpush.msra.mxu1 %v152_v63  ;;  %233 = vmatpush.msra.mxu2 %v958_v29  ;;  %v181_v63 = vsub.f32 %v985_v49, %v1395_v34  ;;  %v176_v21 = vand.u32 4294901760, %v175_v48  ;;  %v450_v48 = vsub.f32 %v1015_v28, %v1399_v0  ;;  %v1414_v0 = vand.u32 4294901760, %v1033_v51 }
  0x1f   :  { %80 = vmatpush.msra.mxu0 %v930_v62  ;;  %276 = vmatpush.msra.mxu3 %v930_v62  ;;  %v1101_v34 = vsub.f32 %v32_v55, %v1070_v22  ;;  %v188_v28 = vand.u32 4294901760, %v187_v59  ;;  %v1416_v55 = vand.u32 4294901760, %v1050_v32 }
  0x20   :  { %159 = vmatpush.msra.mxu1 %v158_v38  ;;  %236 = vmatpush.msra.mxu2 %v966_v35  ;;  %v1077_v38 = vand.u32 4294901760, %v30_v1  ;;  %v182_v53 = vand.u32 4294901760, %v181_v63  ;;  %v456_v6 = vsub.f32 %v1033_v51, %v1414_v0  ;;  %v1103_v63 = vand.u32 4294901760, %v28_v13 }
  0x21   :  { %82 = vmatpush.msra.mxu0 %v948_v8  ;;  %278 = vmatpush.msra.mxu3 %v948_v8  ;;  %v451_v0 = vand.u32 4294901760, %v450_v48  ;;  %v462_v51 = vsub.f32 %v1050_v32, %v1416_v55  ;;  %v1408_v59 = vand.u32 4294901760, %v1101_v34  ;;  %v1133_v55 = vand.u32 4294901760, %v24_v26 }
  0x22   :  { %165 = vmatpush.msra.mxu1 %v164_v41  ;;  %239 = vmatpush.msra.mxu2 %v985_v49  ;;  %v26_v41 = vld [vmem:[%s1375_s1 + $0x58] sm:$0xff]  ;;  %v1131_v48 = vsub.f32 %v28_v13, %v1103_v63  ;;  %v1420_v13 = vand.u32 4294901760, %v1088_v23 }
  0x23   :  { %84 = vmatpush.msra.mxu0 %v968_v36  ;;  %280 = vmatpush.msra.mxu3 %v968_v36  ;;  %v1419_v36 = vand.u32 4294901760, %v815_v16 }
  0x24   :  { %171 = vmatpush.msra.mxu1 %v170_v50  ;;  %242 = vmatpush.msra.mxu2 %v1010_v7  ;;  %v1109_v50 = vsub.f32 %v30_v1, %v1077_v38 }
  0x25   :  { %291 = vmatpush.msrb.mxu0 %v1415_v56  ;;  %440 = vmatpush.msrb.mxu3 %v439_v40  ;;  %v1417_v56 = vand.u32 4294901760, %v811_v15  ;;  %v457_v40 = vand.u32 4294901760, %v456_v6  ;;  %v474_v6 = vsub.f32 %v1088_v23, %v1420_v13 }
  0x26   :  { %395 = vmatpush.msrb.mxu2 %v950_v12  ;;  %177 = vmatpush.msra.mxu1 %v176_v21  ;;  %v1118_v12 = vand.u32 4294901760, %v26_v41  ;;  %v1418_v21 = vand.u32 4294901760, %v1063_v25  ;;  %v1407_v15 = vand.u32 4294901760, %v1109_v50 }
  0x27   :  { %295 = vmatpush.msrb.mxu0 %v1417_v56  ;;  %446 = vmatpush.msrb.mxu3 %v445_v37  ;;  %v1139_v56 = vand.u32 4294901760, %v22_v14  ;;  %v463_v37 = vand.u32 4294901760, %v462_v51  ;;  %v480_v51 = vsub.f32 %v1101_v34, %v1408_v59  ;;  %v475_v13 = vand.u32 4294901760, %v474_v6 }
  0x28   :  { %397 = vmatpush.msrb.mxu2 %v960_v30  ;;  %v468_v1 = vsub.f32 %v1063_v25, %v1418_v21  ;;  %183 = vmatpush.msra.mxu1 %v182_v53  ;;  %v20_v53 = vld [vmem:[%s1375_s1 + $0x28] sm:$0xff]  ;;  %v1148_v21 = vsub.f32 %v26_v41, %v1118_v12  ;;  %v491_v41 = vand.u32 4294901760, %v1131_v48 }
  0x29   :  { %299 = vmatpush.msrb.mxu0 %v1419_v36  ;;  %452 = vmatpush.msrb.mxu3 %v451_v0  ;;  %v18_v36 = vld [vmem:[%s1375_s1 + $0x18] sm:$0xff]  ;;  %v1162_v0 = vsub.f32 %v24_v26, %v1133_v55 }
  0x2a   :  { %399 = vmatpush.msrb.mxu2 %v980_v44  ;;  %189 = vmatpush.msra.mxu1 %v188_v28  ;;  %v469_v16 = vand.u32 4294901760, %v468_v1  ;;  %v1421_v28 = vand.u32 4294901760, %v820_v18  ;;  %v486_v18 = vsub.f32 %v1109_v50, %v1407_v15  ;;  %v1172_v1 = vsub.f32 %v22_v14, %v1139_v56  ;;  %v14_v14 = vld [vmem:[%s1376_s0] sm:$0x1] }
  0x2b   :  { %458 = vmatpush.msrb.mxu3 %v457_v40  ;;  %v1422_v40 = vand.u32 4294901760, %v823_v19  ;;  %v497_v26 = vand.u32 4294901760, %v1148_v21  ;;  %v1423_v19 = vand.u32 4294901760, %v826_v20  ;;  %v492_v6 = vsub.f32 %v1131_v48, %v491_v41 }
  0x2c   :  { %358 = vmatpush.msrb.mxu1 %v779_v3  ;;  %401 = vmatpush.msrb.mxu2 %v998_v60  ;;  %v1164_v3 = vand.u32 4294901760, %v20_v53  ;;  %v487_v15 = vand.u32 4294901760, %v486_v18  ;;  %v509_v59 = vand.u32 4294901760, %v1172_v1  ;;  %v1424_v20 = vand.u32 4294901760, %v841_v27 }
  0x2d   :  { %303 = vmatpush.msrb.mxu0 %v1421_v28  ;;  %464 = vmatpush.msrb.mxu3 %v463_v37  ;;  %v1177_v28 = vand.u32 4294901760, %v18_v36  ;;  %v481_v37 = vand.u32 4294901760, %v480_v51  ;;  %v493_v27 = vand.u32 4294901760, %v492_v6 }
  0x2e   :  { %360 = vmatpush.msrb.mxu1 %v781_v4  ;;  %403 = vmatpush.msrb.mxu2 %v1017_v2  ;;  %v16_v4 = vld [vmem:[%s1375_s1 + $0x8] sm:$0xff] }
  0x2f   :  { %307 = vmatpush.msrb.mxu0 %v1422_v40  ;;  %470 = vmatpush.msrb.mxu3 %v469_v16  ;;  %v1194_v40 = vsub.f32 %v20_v53, %v1164_v3  ;;  %v498_v16 = vsub.f32 %v1148_v21, %v497_v26  ;;  %v1204_v51 = vand.u32 4294901760, %v16_v4  ;;  %v1207_v53 = vsub.f32 %v18_v36, %v1177_v28 }
  0x30   :  { %362 = vmatpush.msrb.mxu1 %v783_v5  ;;  %405 = vmatpush.msrb.mxu2 %v1022_v54  ;;  %v503_v5 = vand.u32 4294901760, %v1162_v0  ;;  %v1426_v36 = vand.u32 4294901760, %v879_v42 }
  0x31   :  { %311 = vmatpush.msrb.mxu0 %v1423_v19  ;;  %476 = vmatpush.msrb.mxu3 %v475_v13  ;;  %v1209_v19 = vand.u32 4294901760, %v14_v14  ;;  %v515_v13 = vand.u32 4294901760, %v1194_v40 }
  0x32   :  { %364 = vmatpush.msrb.mxu1 %v794_v9  ;;  %407 = vmatpush.msrb.mxu2 %v1052_v31  ;;  %v1425_v9 = vand.u32 4294901760, %v871_v39  ;;  %v504_v18 = vsub.f32 %v1162_v0, %v503_v5  ;;  %v499_v39 = vand.u32 4294901760, %v498_v16 }
  0x33   :  { %315 = vmatpush.msrb.mxu0 %v1424_v20  ;;  %482 = vmatpush.msrb.mxu3 %v481_v37  ;;  %v521_v37 = vand.u32 4294901760, %v1207_v53  ;;  %v1228_v6 = vsub.f32 %v14_v14, %v1209_v19  ;;  %v1231_v20 = vsub.f32 %v16_v4, %v1204_v51  ;;  %v1428_v4 = vand.u32 4294901760, %v915_v57 }
  0x34   :  { %366 = vmatpush.msrb.mxu1 %v796_v10  ;;  %409 = vmatpush.msrb.mxu2 %v1070_v22  ;;  %v510_v10 = vsub.f32 %v1172_v1, %v509_v59  ;;  %v505_v42 = vand.u32 4294901760, %v504_v18 }
  0x35   :  { %319 = vmatpush.msrb.mxu0 %v1425_v9  ;;  %488 = vmatpush.msrb.mxu3 %v487_v15  ;;  %v516_v15 = vsub.f32 %v1194_v40, %v515_v13  ;;  %v527_v14 = vand.u32 4294901760, %v1231_v20  ;;  %v1249_v16 = vand.u32 4294901760, %v1228_v6  ;;  %v1430_v9 = vand.u32 4294901760, %v958_v29 }
  0x36   :  { %368 = vmatpush.msrb.mxu1 %v798_v11  ;;  %411 = vmatpush.msrb.mxu2 %v1077_v38  ;;  %v1427_v11 = vand.u32 4294901760, %v902_v52  ;;  %v522_v52 = vsub.f32 %v1207_v53, %v521_v37 }
  0x37   :  { %323 = vmatpush.msrb.mxu0 %v1426_v36  ;;  %494 = vmatpush.msrb.mxu3 %v493_v27  ;;  %v517_v57 = vand.u32 4294901760, %v516_v15  ;;  %v88_v18 = vsub.f32 %v1228_v6, %v1249_v16 }
  0x38   :  { %370 = vmatpush.msrb.mxu1 %v817_v17  ;;  %413 = vmatpush.msrb.mxu2 %v1103_v63  ;;  %v511_v17 = vand.u32 4294901760, %v510_v10  ;;  %v523_v27 = vand.u32 4294901760, %v522_v52 }
  0x39   :  { %327 = vmatpush.msrb.mxu0 %v1427_v11  ;;  %500 = vmatpush.msrb.mxu3 %v499_v39  ;;  %v89_v10 = vand.u32 4294901760, %v88_v18  ;;  %v1443_v39 = vand.u32 4294901760, %v1050_v32 }
  0x3a   :  { %372 = vmatpush.msrb.mxu1 %v833_v24  ;;  %415 = vmatpush.msrb.mxu2 %v1118_v12  ;;  %v1429_v24 = vand.u32 4294901760, %v928_v61  ;;  %v1432_v61 = vand.u32 4294901760, %v985_v49  ;;  %v1437_v49 = vld [vmem:[#allocation2_spill] sm:$0xff] }
  0x3b   :  { %331 = vmatpush.msrb.mxu0 %v1428_v4  ;;  %506 = vmatpush.msrb.mxu3 %v505_v42 }
  0x3c   :  { %374 = vmatpush.msrb.mxu1 %v857_v33  ;;  %417 = vmatpush.msrb.mxu2 %v1133_v55  ;;  %v528_v33 = vsub.f32 %v1231_v20, %v527_v14 }
  0x3d   :  { %335 = vmatpush.msrb.mxu0 %v1429_v24  ;;  %512 = vmatpush.msrb.mxu3 %v511_v17 }
  0x3e   :  { %376 = vmatpush.msrb.mxu1 %v885_v45  ;;  %419 = vmatpush.msrb.mxu2 %v1139_v56  ;;  %v1431_v45 = vand.u32 4294901760, %v966_v35  ;;  %v529_v29 = vand.u32 4294901760, %v528_v33 }
  0x3f   :  { %339 = vmatpush.msrb.mxu0 %v1430_v9  ;;  %518 = vmatpush.msrb.mxu3 %v517_v57 }
  0x40   :  { %378 = vmatpush.msrb.mxu1 %v887_v46  ;;  %421 = vmatpush.msrb.mxu2 %v1164_v3  ;;  %v1433_v46 = vand.u32 4294901760, %v1010_v7  ;;  %v1438_v7 = vld [vmem:[#allocation3_spill] sm:$0xff] }
  0x41   :  { %343 = vmatpush.msrb.mxu0 %v1431_v45  ;;  %524 = vmatpush.msrb.mxu3 %v523_v27 }
  0x42   :  { %380 = vmatpush.msrb.mxu1 %v891_v47  ;;  %423 = vmatpush.msrb.mxu2 %v1177_v28  ;;  %v1434_v47 = vand.u32 4294901760, %v978_v43 }
  0x43   :  { %347 = vmatpush.msrb.mxu0 %v1432_v61  ;;  %245 = vmatmul.f32.vlgmr.msra.gmra.mxu2 %v1228_v6 }
  0x44   :  { %382 = vmatpush.msrb.mxu1 %v917_v58  ;;  %425 = vmatpush.msrb.mxu2 %v1204_v51  ;;  %v1435_v58 = vld [vmem:[#allocation4_spill] sm:$0xff] }
  0x45   :  { %351 = vmatpush.msrb.mxu0 %v1433_v46  ;;  %530 = vmatpush.msrb.mxu3 %v529_v29  ;;  %v1436_v35 = vand.u32 4294901760, %v1435_v58 }
  0x46   :  { %384 = vmatpush.msrb.mxu1 %v930_v62  ;;  %632 = vmatpush.msra.mxu2 %v1434_v47  ;;  %v1439_v62 = vld [vmem:[#allocation5_spill] sm:$0xff] }
  0x47   :  { %90 = vmatmul.f32.vlgmr.msra.gmra.mxu0 %v89_v10  ;;  %284 = vmatmul.f32.vlgmr.msra.gmra.mxu3 %v1249_v16  ;;  %v1440_v36 = vand.u32 4294901760, %v1439_v62 }
  0x48   :  { %386 = vmatpush.msrb.mxu1 %v948_v8  ;;  %538 = vmatpush.msra.mxu0 %v978_v43  ;;  %v1441_v8 = vld [vmem:[#allocation6_spill] sm:$0xff] }
  0x49   :  { %636 = vmatpush.msra.mxu2 %v1436_v35  ;;  %699 = vmatpush.msra.mxu3 %v1437_v49  ;;  %v1442_v43 = vand.u32 4294901760, %v1441_v8 }
  0x4a   :  { %388 = vmatpush.msrb.mxu1 %v1438_v7  ;;  %541 = vmatpush.msra.mxu0 %v1435_v58 }
  0x4b   :  { %191 = vmatmul.f32.vlgmr.msra.gmra.mxu1 %v1209_v19  ;;  %640 = vmatpush.msra.mxu2 %v1440_v36 }
  0x4c   :  { %591 = vmatpush.msra.mxu1 %v1437_v49  ;;  %701 = vmatpush.msra.mxu3 %v960_v30 }
  0x4d   :  { %544 = vmatpush.msra.mxu0 %v1439_v62  ;;  %644 = vmatpush.msra.mxu2 %v1442_v43 }
  0x4e   :  { %593 = vmatpush.msra.mxu1 %v960_v30  ;;  %703 = vmatpush.msra.mxu3 %v980_v44  ;;  %v1444_v30 = vand.u32 4294901760, %v1063_v25 }
  0x4f   :  { %547 = vmatpush.msra.mxu0 %v1441_v8  ;;  %648 = vmatpush.msra.mxu2 %v1443_v39 }
  0x50   :  { %595 = vmatpush.msra.mxu1 %v980_v44  ;;  %705 = vmatpush.msra.mxu3 %v998_v60  ;;  %v1445_v44 = vand.u32 4294901760, %v1088_v23 }
  0x51   :  { %353 = vmatmul.f32.vlgmr.msrb.gmra.mxu0 %v1209_v19  ;;  %652 = vmatpush.msra.mxu2 %v1444_v30 }
  0x52   :  { %550 = vmatpush.msra.mxu0 %v1050_v32  ;;  %597 = vmatpush.msra.mxu1 %v998_v60  ;;  %v1446_v32 = vand.u32 4294901760, %v1101_v34 }
  0x53   :  { %707 = vmatpush.msra.mxu3 %v1017_v2  ;;  %390 = vmatmul.f32.vlgmr.msrb.gmra.mxu1 %v1209_v19 }
  0x54   :  { %553 = vmatpush.msra.mxu0 %v1063_v25  ;;  %599 = vmatpush.msra.mxu1 %v1017_v2  ;;  %v1447_v2 = vand.u32 4294901760, %v1109_v50 }
  0x55   :  { %656 = vmatpush.msra.mxu2 %v1445_v44  ;;  %709 = vmatpush.msra.mxu3 %v1022_v54 }
  0x56   :  { %556 = vmatpush.msra.mxu0 %v1088_v23  ;;  %601 = vmatpush.msra.mxu1 %v1022_v54  ;;  %v47_v23 = vld [vmem:[%s1377_s2] sm:$0x3] }
  0x57   :  { %660 = vmatpush.msra.mxu2 %v1446_v32  ;;  %711 = vmatpush.msra.mxu3 %v1052_v31  ;;  %v49_v54 = vperm.slane %v47_v23, 0 }
  0x58   :  { %559 = vmatpush.msra.mxu0 %v1101_v34  ;;  %603 = vmatpush.msra.mxu1 %v1052_v31 }
  0x59   :  { %664 = vmatpush.msra.mxu2 %v1447_v2  ;;  %713 = vmatpush.msra.mxu3 %v1070_v22 }
  0x5a   :  { %562 = vmatpush.msra.mxu0 %v1109_v50  ;;  %605 = vmatpush.msra.mxu1 %v1070_v22 }
  0x5b   :  { %668 = vmatpush.msra.mxu2 %v491_v41  ;;  %715 = vmatpush.msra.mxu3 %v1077_v38 }
  0x5c   :  { %565 = vmatpush.msra.mxu0 %v1131_v48  ;;  %607 = vmatpush.msra.mxu1 %v1077_v38  ;;  %v50_v38 = vperm.slane %v47_v23, 1 }
  0x5d   :  { %672 = vmatpush.msra.mxu2 %v497_v26  ;;  %717 = vmatpush.msra.mxu3 %v1103_v63 }
  0x5e   :  { %568 = vmatpush.msra.mxu0 %v1148_v21  ;;  %609 = vmatpush.msra.mxu1 %v1103_v63 }
  0x5f   :  { %676 = vmatpush.msra.mxu2 %v503_v5  ;;  %719 = vmatpush.msra.mxu3 %v1118_v12 }
  0x60   :  { %431 = vmatmul.f32.vlgmr.msrb.gmra.mxu2 %v89_v10  ;;  %571 = vmatpush.msra.mxu0 %v1162_v0 }
  0x61   :  { %611 = vmatpush.msra.mxu1 %v1118_v12  ;;  %680 = vmatpush.msra.mxu2 %v509_v59 }
  0x62   :  { %721 = vmatpush.msra.mxu3 %v1133_v55  ;;  %574 = vmatpush.msra.mxu0 %v1172_v1 }
  0x63   :  { %532 = vmatmul.f32.vlgmr.msrb.gmra.mxu3 %v1209_v19  ;;  %613 = vmatpush.msra.mxu1 %v1133_v55 }
  0x64   :  { %684 = vmatpush.msra.mxu2 %v515_v13  ;;  %723 = vmatpush.msra.mxu3 %v1139_v56 }
  0x65   :  { %577 = vmatpush.msra.mxu0 %v1194_v40  ;;  %615 = vmatpush.msra.mxu1 %v1139_v56 }
  0x66   :  { %688 = vmatpush.msra.mxu2 %v521_v37  ;;  %725 = vmatpush.msra.mxu3 %v1164_v3 }
  0x67   :  { %580 = vmatpush.msra.mxu0 %v1207_v53  ;;  %617 = vmatpush.msra.mxu1 %v1164_v3 }
  0x68   :  { %692 = vmatpush.msra.mxu2 %v527_v14  ;;  %727 = vmatpush.msra.mxu3 %v1177_v28 }
  0x69   :  { %694 = vmatmul.f32.vlgmr.msra.gmra.mxu2 %v1209_v19  ;;  %583 = vmatpush.msra.mxu0 %v1231_v20 }
  0x6a   :  { %619 = vmatpush.msra.mxu1 %v1177_v28  ;;  %729 = vmatpush.msra.mxu3 %v1204_v51 }
  0x6b   :  { %586 = vmatmul.f32.vlgmr.msra.gmra.mxu0 %v1228_v6  ;;  %731 = vmatmul.f32.vlgmr.msra.gmra.mxu3 %v1209_v19 }
  0x6c   :  { %621 = vmatpush.msra.mxu1 %v1204_v51  ;;  %v741_v51 = vlaneseq }
  0x6d   :  { %625 = vmatmul.f32.vlgmr.msra.gmra.mxu1 %v1249_v16 }
  0x6e   :  { %vm743_vm1 = vcmp.lt.s32.totalorder %v741_v51, 256 }
  0xc4   :  { %v91_v22 = vpop.f32.mrf.mxu0 }
  0xc5   :  { %v92_v34 = vadd.f32 %v91_v22, %v49_v54 }
  0xc6   :  { %v246_v12 = vpop.f32.mrf.mxu2 }
  0xc8   :  { %v192_v31 = vpop.f32.mrf.mxu1 }
  0xc9   :  { %v193_v63 = vadd.f32 %v192_v31, %v92_v34 }
  0xca   :  { %v285_v60 = vpop.f32.mrf.mxu3 }
  0xcb   :  { %v247_v55 = vadd.f32 %v246_v12, %v193_v63 }
  0xcd   :  { %v286_v3 = vadd.f32 %v285_v60, %v247_v55 }
  0xce   :  { %v354_v25 = vpop.f32.mrf.mxu0 }
  0xcf   :  { %v355_v40 = vadd.f32 %v354_v25, %v286_v3 }
  0xd0   :  { %v391_v50 = vpop.f32.mrf.mxu1 }
  0xd1   :  { %v392_v13 = vadd.f32 %v391_v50, %v355_v40 }
  0xe3   :  { %v432_v59 = vpop.f32.mrf.mxu2 }
  0xe4   :  { %v433_v48 = vadd.f32 %v432_v59, %v50_v38 }
  0xe6   :  { %v533_v56 = vpop.f32.mrf.mxu3 }
  0xe7   :  { %v534_v21 = vadd.f32 %v533_v56, %v433_v48 }
  0xe8   :  { %v587_v41 = vpop.f32.mrf.mxu0 }
  0xe9   :  { %v588_v0 = vadd.f32 %v587_v41, %v534_v21 }
  0xea   :  { %v626_v1 = vpop.f32.mrf.mxu1 }
  0xeb   :  { %v627_v26 = vadd.f32 %v626_v1, %v588_v0 }
  0xec   :  { %v695_v28 = vpop.f32.mrf.mxu2 }
  0xed   :  { %v696_v5 = vadd.f32 %v695_v28, %v627_v26 }
  0xee   :  { %v732_v53 = vpop.f32.mrf.mxu3 }
  0xef   :  { %v733_v19 = vadd.f32 %v732_v53, %v696_v5 }
  0xf1   :  { %v737_v37 = vrot.slane %v733_v19, 7 }
  0xf3   :  { %v739_v6 = vsel %vm738_vm0, %v392_v13, %v737_v37 }
  0xf4   :  { %745 = vst.msk [vmem:[%s1378_s3] sm:$0x3] %vm743_vm1, %v739_v6 }

</bundles_post_ra>
